<compile_context>
chip_gen: v6e
topology: v6e:2x2x1
jax: 0.10.0
libtpu: 0.0.40
codegen_flags: <defaults>
</compile_context>

<pallas_src>
import functools

import jax
import jax.numpy as jnp
from jax import lax
from jax.experimental import pallas as pl
from jax.experimental.pallas import tpu as pltpu


_VMEM_LIMIT = 32 * 1024 * 1024  # explicit scoped-VMEM budget; safe on v5e/v6e/v7x


def _pad_dim(x, axis, multiple):
    size = x.shape[axis]
    rem = (-size) % multiple
    if rem == 0:
        return x
    pads = [(0, 0)] * x.ndim
    pads[axis] = (0, rem)
    return jnp.pad(x, pads)


# ----------------------------- tiled linear (matmul) kernels -----------------------------

def _mm_kernel(x_ref, w_ref, o_ref, acc_ref):
    @pl.when(pl.program_id(2) == 0)
    def _():
        acc_ref[...] = jnp.zeros(acc_ref.shape, acc_ref.dtype)

    acc_ref[...] += jnp.dot(x_ref[...], w_ref[...],
                            preferred_element_type=jnp.float32)

    @pl.when(pl.program_id(2) == pl.num_programs(2) - 1)
    def _():
        o_ref[...] = acc_ref[...].astype(o_ref.dtype)


def _mm_bias_kernel(x_ref, w_ref, b_ref, o_ref, acc_ref):
    @pl.when(pl.program_id(2) == 0)
    def _():
        acc_ref[...] = jnp.zeros(acc_ref.shape, acc_ref.dtype)

    acc_ref[...] += jnp.dot(x_ref[...], w_ref[...],
                            preferred_element_type=jnp.float32)

    @pl.when(pl.program_id(2) == pl.num_programs(2) - 1)
    def _():
        o_ref[...] = (acc_ref[...] + b_ref[...].astype(jnp.float32)).astype(o_ref.dtype)


def linear(x, w, b=None, *, tm=256, tn=512, tk=512):
    """y = x @ w (+ b).  x: (M, K), w: (K, N), b: (N,) or None -> (M, N).

    Tiled, pipelined matmul: grid (M/tm, N/tn, K/tk), f32 accumulator scratch,
    reduction (K) axis last and marked "arbitrary".  Non-divisible dims are
    zero-padded (exact for the K reduction) and the result is sliced back.
    """
    M, K = x.shape
    K2, N = w.shape
    assert K == K2
    tm, tk, tn = min(tm, M), min(tk, K), min(tn, N)

    xp = _pad_dim(_pad_dim(x, 0, tm), 1, tk)
    wp = _pad_dim(_pad_dim(w, 0, tk), 1, tn)
    Mp, Kp = xp.shape
    Np = wp.shape[1]
    grid = (Mp // tm, Np // tn, Kp // tk)

    in_specs = [
        pl.BlockSpec((tm, tk), lambda i, j, k: (i, k)),
        pl.BlockSpec((tk, tn), lambda i, j, k: (k, j)),
    ]
    operands = [xp, wp]
    kernel = _mm_kernel
    if b is not None:
        bp = _pad_dim(b, 0, tn).reshape(1, Np)
        in_specs.append(pl.BlockSpec((1, tn), lambda i, j, k: (0, j)))
        operands.append(bp)
        kernel = _mm_bias_kernel

    out = pl.pallas_call(
        kernel,
        out_shape=jax.ShapeDtypeStruct((Mp, Np), x.dtype),
        grid=grid,
        in_specs=in_specs,
        out_specs=pl.BlockSpec((tm, tn), lambda i, j, k: (i, j)),
        scratch_shapes=[pltpu.VMEM((tm, tn), jnp.float32)],
        compiler_params=pltpu.CompilerParams(
            dimension_semantics=("parallel", "parallel", "arbitrary"),
            vmem_limit_bytes=_VMEM_LIMIT,
        ),
    )(*operands)
    if (Mp, Np) != (M, N):
        out = out[:M, :N]
    return out


# ----------------------------- flash-style attention kernel -----------------------------

def _flash_attn_kernel(q_ref, k_ref, v_ref, o_ref, m_sc, l_sc, acc_sc, *,
                       scale, heads, kv_len, mask_kv):
    ki = pl.program_id(2)

    @pl.when(ki == 0)
    def _():
        m_sc[...] = jnp.full(m_sc.shape, -jnp.inf, m_sc.dtype)
        l_sc[...] = jnp.zeros(l_sc.shape, l_sc.dtype)
        acc_sc[...] = jnp.zeros(acc_sc.shape, acc_sc.dtype)

    qb = q_ref[0]          # (tq,  H, d) — kept in input dtype (bf16 stays bf16 on MXU)
    kb = k_ref[0]          # (tkv, H, d)
    vb = v_ref[0]          # (tkv, H, d)
    tkv = kb.shape[0]

    if mask_kv:
        col_ok = (lax.broadcasted_iota(jnp.int32, (1, tkv), 1) + ki * tkv) < kv_len

    for hh in range(heads):                               # static unroll over heads
        q = qb[:, hh, :] * scale                          # pre-scaled query, (tq, d)
        k = kb[:, hh, :]                                  # (tkv, d)
        v = vb[:, hh, :]                                  # (tkv, d)
        # QK^T without materializing a K transpose: contract the last dims.
        s = lax.dot_general(q, k, (((1,), (1,)), ((), ())),
                            preferred_element_type=jnp.float32)   # (tq, tkv) f32
        if mask_kv:
            s = jnp.where(col_ok, s, -jnp.inf)

        m_prev = m_sc[hh]                                         # (tq, 1)
        m_new = jnp.maximum(m_prev, jnp.max(s, axis=-1, keepdims=True))
        alpha = jnp.exp(m_prev - m_new)
        p = jnp.exp(s - m_new)                                    # (tq, tkv) f32
        l_sc[hh] = alpha * l_sc[hh] + jnp.sum(p, axis=-1, keepdims=True)
        acc_sc[hh] = alpha * acc_sc[hh] + lax.dot_general(
            p.astype(v.dtype), v, (((1,), (0,)), ((), ())),
            preferred_element_type=jnp.float32)                   # (tq, d)
        m_sc[hh] = m_new

    @pl.when(ki == pl.num_programs(2) - 1)
    def _():
        for hh in range(heads):
            # Normalize the small (tq, d) accumulator once (EUP reciprocal),
            # not the O(tq*tkv) probability matrix.
            inv = pl.reciprocal(l_sc[hh], approx=True)            # (tq, 1)
            o_ref[0, :, hh, :] = (acc_sc[hh] * inv).astype(o_ref.dtype)


def flash_attention(q, k, v, scale, *, tq=128, tkv=128):
    """q: (B, Nq, H, D); k, v: (B, Nk, H, D) -> (B, Nq, H, D)."""
    B, Nq, H, D = q.shape
    Nk = k.shape[1]
    tq, tkv = min(tq, Nq), min(tkv, Nk)

    qp = _pad_dim(q, 1, tq)
    kp = _pad_dim(k, 1, tkv)
    vp = _pad_dim(v, 1, tkv)
    Nqp, Nkp = qp.shape[1], kp.shape[1]

    kernel = functools.partial(
        _flash_attn_kernel, scale=scale, heads=H, kv_len=Nk, mask_kv=(Nkp != Nk))

    out = pl.pallas_call(
        kernel,
        out_shape=jax.ShapeDtypeStruct((B, Nqp, H, D), q.dtype),
        grid=(B, Nqp // tq, Nkp // tkv),
        in_specs=[
            pl.BlockSpec((1, tq, H, D), lambda b, qi, ki: (b, qi, 0, 0)),
            pl.BlockSpec((1, tkv, H, D), lambda b, qi, ki: (b, ki, 0, 0)),
            pl.BlockSpec((1, tkv, H, D), lambda b, qi, ki: (b, ki, 0, 0)),
        ],
        out_specs=pl.BlockSpec((1, tq, H, D), lambda b, qi, ki: (b, qi, 0, 0)),
        scratch_shapes=[
            pltpu.VMEM((H, tq, 1), jnp.float32),   # running max  m
            pltpu.VMEM((H, tq, 1), jnp.float32),   # running sum  l
            pltpu.VMEM((H, tq, D), jnp.float32),   # f32 output accumulator
        ],
        compiler_params=pltpu.CompilerParams(
            dimension_semantics=("parallel", "parallel", "arbitrary"),
            vmem_limit_bytes=_VMEM_LIMIT,
        ),
    )(qp, kp, vp)
    if Nqp != Nq:
        out = out[:, :Nq]
    return out


# ----------------------------- module wrapper -----------------------------

class PallasAttention:
    """Mirror of the PyTorch Attention module (apply_rotary_emb=False, mask=None, dropout=0)."""
    # TODO(synk): rotary embeddings, attention mask and dropout are not implemented
    # (they are disabled at the module defaults exercised here).

    def __init__(self, query_dim, context_dim=None, heads=8, dim_head=64, key=None):
        inner_dim = dim_head * heads
        context_dim = query_dim if context_dim is None else context_dim
        self.scale = dim_head ** (-0.5)
        self.heads = heads
        self.dim_head = dim_head
        self.query_dim = query_dim
        self.context_dim = context_dim

        if key is None:
            key = jax.random.PRNGKey(0)
        k1, k2, k3, k4 = jax.random.split(key, 4)
        # weights stored as (in, out) so y = x @ W (+ b); deterministic init.
        self.w_q = (jax.random.normal(k1, (query_dim, inner_dim), jnp.float32)
                    * (query_dim ** -0.5))
        self.w_kv = (jax.random.normal(k2, (context_dim, inner_dim * 2), jnp.float32)
                     * (context_dim ** -0.5))
        self.w_out = (jax.random.normal(k3, (inner_dim, query_dim), jnp.float32)
                      * (inner_dim ** -0.5))
        self.b_out = jax.random.normal(k4, (query_dim,), jnp.float32) * 0.01
        # Fused [W_q | W_kv] for the self-attention path: one HBM pass over the
        # activations instead of two.
        self.w_qkv = (jnp.concatenate([self.w_q, self.w_kv], axis=1)
                      if context_dim == query_dim else None)

    def __call__(self, queries, context=None):
        B, Nq, Dq = queries.shape
        h, d = self.heads, self.dim_head
        inner = h * d

        if context is None and self.w_qkv is not None:
            qkv = linear(queries.reshape(B * Nq, Dq), self.w_qkv)   # (B*Nq, 3*inner)
            q = qkv[:, :inner]
            k = qkv[:, inner:2 * inner]
            v = qkv[:, 2 * inner:]
            Nk = Nq
        else:
            context = queries if context is None else context
            _, Nk, Dc = context.shape
            q = linear(queries.reshape(B * Nq, Dq), self.w_q)
            kv = linear(context.reshape(B * Nk, Dc), self.w_kv)
            k, v = kv[:, :inner], kv[:, inner:]

        # (B, N, h, d): pure reshapes — no '(b h) n d' transposes / HBM round trips.
        q4 = q.reshape(B, Nq, h, d)
        k4 = k.reshape(B, Nk, h, d)
        v4 = v.reshape(B, Nk, h, d)

        o4 = flash_attention(q4, k4, v4, self.scale)                # (B, Nq, h, d)

        out = linear(o4.reshape(B * Nq, inner), self.w_out, self.b_out)
        return out.reshape(B, Nq, Dq)


# ----------------------------- reference (plain JAX) -----------------------------

def reference_forward(mod: PallasAttention, queries, context=None):
    B, Nq, Dq = queries.shape
    context = queries if context is None else context
    _, Nk, _ = context.shape
    h, d = mod.heads, mod.dim_head
    inner = h * d
    q = queries @ mod.w_q
    kv = context @ mod.w_kv
    k, v = kv[..., :inner], kv[..., inner:]
    qh = q.reshape(B, Nq, h, d).transpose(0, 2, 1, 3)
    kh = k.reshape(B, Nk, h, d).transpose(0, 2, 1, 3)
    vh = v.reshape(B, Nk, h, d).transpose(0, 2, 1, 3)
    sim = jnp.einsum("bhid,bhjd->bhij", qh, kh) * mod.scale
    attn = jax.nn.softmax(sim, axis=-1)
    oh = jnp.einsum("bhij,bhjd->bhid", attn, vh)
    out = oh.transpose(0, 2, 1, 3).reshape(B, Nq, inner)
    return out @ mod.w_out + mod.b_out


# ----------------------------- main -----------------------------

if __name__ == "__main__":
    key = jax.random.PRNGKey(0)
    k_mod, k_x, k_ctx = jax.random.split(key, 3)

    B, N, query_dim = 2, 8, 32
    heads, dim_head = 4, 16

    mod = PallasAttention(query_dim=query_dim, heads=heads, dim_head=dim_head, key=k_mod)
    x = jax.random.normal(k_x, (B, N, query_dim), jnp.float32)

    # self-attention (fused QKV projection path)
    out = jax.block_until_ready(mod(x))
    ref = reference_forward(mod, x)
    assert out.shape == (B, N, query_dim)
    # tolerance accounts for the approximate (EUP) reciprocal in the softmax normalization
    assert jnp.allclose(out, ref, atol=5e-3, rtol=5e-3), "self-attention mismatch vs reference"

    # cross-attention path (separate q / kv projections)
    ctx = jax.random.normal(k_ctx, (B, 12, query_dim), jnp.float32)
    out_c = jax.block_until_ready(mod(x, ctx))
    ref_c = reference_forward(mod, x, ctx)
    assert jnp.allclose(out_c, ref_c, atol=5e-3, rtol=5e-3), "cross-attention mismatch vs reference"

    print("KERNEL_OK")
</pallas_src>

<mosaic_0001>
module attributes {stable_mosaic.version = 11 : i64} {
  func.func @_mm_kernel(%arg0: i32, %arg1: i32, %arg2: i32, %arg3: memref<16x32xf32, #tpu.memory_space<vmem>>, %arg4: memref<32x192xf32, #tpu.memory_space<vmem>>, %arg5: memref<16x192xf32, #tpu.memory_space<vmem>>, %arg6: memref<16x192xf32, #tpu.memory_space<vmem>>) attributes {dimension_semantics = [#tpu.dimension_semantics<parallel>, #tpu.dimension_semantics<parallel>, #tpu.dimension_semantics<arbitrary>], iteration_bounds = array<i64: 1, 1, 1>, scalar_prefetch = 0 : i64, scratch_operands = 1 : i64, tpu.core_type = #tpu.core_type<tc>, window_params = [{transform_indices = @transform_0, window_bounds = array<i64: 16, 32>}, {transform_indices = @transform_1, window_bounds = array<i64: 32, 192>}, {transform_indices = @transform_2, window_bounds = array<i64: 16, 192>}]} {
    %c0_i32 = arith.constant 0 : i32
    %0 = arith.cmpi eq, %arg2, %c0_i32 : i32
    %1 = arith.extui %0 : i1 to i32
    %c0_i32_0 = arith.constant 0 : i32
    %2 = arith.cmpi ne, %1, %c0_i32_0 : i32
    scf.if %2 {
      %cst_10 = arith.constant 0.000000e+00 : f32
      %12 = vector.broadcast %cst_10 : f32 to vector<16x192xf32>
      %c0_11 = arith.constant 0 : index
      %c0_12 = arith.constant 0 : index
      %13 = vector.load %arg6[%c0_11, %c0_12] : memref<16x192xf32, #tpu.memory_space<vmem>>, vector<16x192xf32>
      tpu.vector_store %arg6[%c0_11, %c0_12], %12 {strides = array<i32>} : memref<16x192xf32, #tpu.memory_space<vmem>>, vector<16x192xf32>,
    } else {
    }
    %c0 = arith.constant 0 : index
    %c0_1 = arith.constant 0 : index
    %3 = vector.load %arg6[%c0, %c0_1] : memref<16x192xf32, #tpu.memory_space<vmem>>, vector<16x192xf32>
    %c0_2 = arith.constant 0 : index
    %c0_3 = arith.constant 0 : index
    %4 = vector.load %arg3[%c0_2, %c0_3] : memref<16x32xf32, #tpu.memory_space<vmem>>, vector<16x32xf32>
    %c0_4 = arith.constant 0 : index
    %c0_5 = arith.constant 0 : index
    %5 = vector.load %arg4[%c0_4, %c0_5] : memref<32x192xf32, #tpu.memory_space<vmem>>, vector<32x192xf32>
    %cst = arith.constant dense<0.000000e+00> : vector<16x192xf32>
    %6 = tpu.matmul %4, %5, %cst {dimension_numbers = #tpu.dot_dimension_numbers<[1], [0], [0], [1], [0, 0, 1, 1], [], []>} : vector<16x32xf32>, vector<32x192xf32>, vector<16x192xf32> -> vector<16x192xf32>
    %7 = arith.addf %3, %6 : vector<16x192xf32>
    %c0_6 = arith.constant 0 : index
    %c0_7 = arith.constant 0 : index
    %8 = vector.load %arg6[%c0_6, %c0_7] : memref<16x192xf32, #tpu.memory_space<vmem>>, vector<16x192xf32>
    tpu.vector_store %arg6[%c0_6, %c0_7], %7 {strides = array<i32>} : memref<16x192xf32, #tpu.memory_space<vmem>>, vector<16x192xf32>,
    %c0_i32_8 = arith.constant 0 : i32
    %9 = arith.cmpi eq, %arg2, %c0_i32_8 : i32
    %10 = arith.extui %9 : i1 to i32
    %c0_i32_9 = arith.constant 0 : i32
    %11 = arith.cmpi ne, %10, %c0_i32_9 : i32
    scf.if %11 {
      %c0_10 = arith.constant 0 : index
      %c0_11 = arith.constant 0 : index
      %12 = vector.load %arg6[%c0_10, %c0_11] : memref<16x192xf32, #tpu.memory_space<vmem>>, vector<16x192xf32>
      %c0_12 = arith.constant 0 : index
      %c0_13 = arith.constant 0 : index
      %13 = vector.load %arg5[%c0_12, %c0_13] : memref<16x192xf32, #tpu.memory_space<vmem>>, vector<16x192xf32>
      tpu.vector_store %arg5[%c0_12, %c0_13], %12 {strides = array<i32>} : memref<16x192xf32, #tpu.memory_space<vmem>>, vector<16x192xf32>,
    } else {
    }
    return
  }
  func.func @transform_0(%arg0: i32, %arg1: i32, %arg2: i32) -> (i32, i32) {
    %c0_i32 = arith.constant 0 : i32
    return %arg0, %arg2 : i32, i32
  }
  func.func @transform_1(%arg0: i32, %arg1: i32, %arg2: i32) -> (i32, i32) {
    %c0_i32 = arith.constant 0 : i32
    return %arg2, %arg1 : i32, i32
  }
  func.func @transform_2(%arg0: i32, %arg1: i32, %arg2: i32) -> (i32, i32) {
    %c0_i32 = arith.constant 0 : i32
    return %arg0, %arg1 : i32, i32
  }
}

</mosaic_0001>

<bundles_post_ra>
// kernel: tpu_custom_call.1
= control target key start
LH: loop header
LB: loop body
LE: loop exit
PB: predicated region body
PF: predicated region fallthrough
CT: control target
= control target key end

     0   :  { %7 = vsyncpa [#allocation4], 0  ;;  %s313_s0 = inlined_call_operand.hbm [shape: f32[16,32], index: 0, kind: input, shape index: {}]   ;;  %s314_s1 = inlined_call_operand.hbm [shape: f32[32,192], index: 1, kind: input, shape index: {}]   ;;  %s315_s2 = inlined_call_operand.hbm [shape: f32[16,192], index: 2, kind: output, shape index: {}]  }
   0x1   :  { %8 = vsyncpa [#allocation7], 0 }
   0x2   :  { %9 = vsyncpa [#allocation5], 0  ;;  %s269_s9 = smov [#allocation3]  }
   0x3   :  { %s15_s10 = sshll.u32 %s269_s9, 4  ;;  %s16_s10 = int_to_ptr.vmem [resolvable:$true] %s15_s10 }
   0x4   :  { %s211_s11 = scalar_lea.vmem %s16_s10, 256  ;;  %p216_p1 = scmp.lt.s32.totalorder %s16_s10, %s16_s10 }
   0x5   :  { %p212_p0 = scmp.ne.s32.totalorder %s16_s10, %s211_s11  ;;  %p217_p2 = scmp.lt.s32.totalorder %s211_s11, %s211_s11 }
   0x7   :  { %p218_p3 = por %p217_p2, %p216_p1 }
   0x9   :  { %p219_p4 = pnand %p218_p3, %p212_p0 }
   0xb   :  { %222 = shalt.err (!%p219_p4)
}
   0xc   :  { %s270_s12 = smov 128   ;;  %s271_s13 = smov 8  }
   0xd   :  { %21 = dma.hbm_to_vmem [thread:$0]  %s313_s0, 256, %s16_s10, [#allocation4], %s270_s12, %s270_s12, %s271_s13  }
   0xe   :  { %s272_s16 = smov [#allocation6]  }
   0xf   :  { %s27_s17 = sshll.u32 %s272_s16, 4  ;;  %s28_s17 = int_to_ptr.vmem [resolvable:$true] %s27_s17 }
  0x10   :  { %s231_s18 = scalar_lea.vmem %s28_s17, 1024  ;;  %p236_p6 = scmp.lt.s32.totalorder %s28_s17, %s28_s17 }
  0x11   :  { %p232_p5 = scmp.ne.s32.totalorder %s28_s17, %s231_s18  ;;  %p237_p7 = scmp.lt.s32.totalorder %s231_s18, %s231_s18 }
  0x13   :  { %p238_p8 = por %p237_p7, %p236_p6 }
  0x15   :  { %p239_p9 = pnand %p238_p8, %p232_p5 }
  0x17   :  { %242 = shalt.err (!%p239_p9)
}
  0x18   :  { %s273_s19 = smov 256   ;;  %s274_s20 = smov 16  }
  0x19   :  { %33 = dma.hbm_to_vmem [thread:$0]  %s314_s1, 1024, %s28_s17, [#allocation7], %s273_s19, %s273_s19, %s274_s20  }
  0x1a   :  { %263 = dma.done.wait [#allocation4], 256  }
  0x1b   :  { %264 = vsyncadd [#allocation4], 4294967040 }
  0x1c   :  { %265 = dma.done.wait [#allocation7], 1024  }
  0x1d   :  { %266 = vsyncadd [#allocation7], 4294966272  ;;  %v275_v0 = vmov 0.0   ;;  %v62_v1 = vld [vmem:[#allocation6 + $0x38] sm:$0xff]  ;;  %v61_v2 = vld [vmem:[#allocation6 + $0x30] sm:$0xff]  ;;  %vm63_vm0 = vcmask 261120  }
  0x1e   :  { %134 = vmatprep.mubr.f32.mxu0 %v275_v0  ;;  %140 = vmatprep.mubr.f32.mxu1 %v275_v0  ;;  %v60_v3 = vld [vmem:[#allocation6 + $0x28] sm:$0xff]  ;;  %v59_v4 = vld [vmem:[#allocation6 + $0x20] sm:$0xff]  ;;  %v58_v5 = vld [vmem:[#allocation6 + $0x18] sm:$0xff]  ;;  %vm45_vm1 = vcmask 523264   ;;  %s276_s0 = smov [#allocation8]  }
  0x1f   :  { %94 = vmatprep.subr.mxu0 %v62_v1  ;;  %187 = vmatprep.subr.mxu1 %v62_v1  ;;  %v57_v6 = vld [vmem:[#allocation6 + $0x10] sm:$0xff]  ;;  %v56_v7 = vld [vmem:[#allocation6 + $0x8] sm:$0xff]  ;;  %v55_v8 = vld [vmem:[#allocation6] sm:$0xff]  ;;  %46 = vst.msk [vmem:[#allocation2 + $0x8] sm:$0xff] %vm45_vm1, %v275_v0  ;;  %s172_s1 = sshll.u32 %s276_s0, 4  ;;  %s173_s1 = int_to_ptr.vmem [resolvable:$true] %s172_s1 }
  0x20   :  { %95 = vmatpush1.msra.mxu0 %v61_v2  ;;  %191 = vmatpush1.msra.mxu1 %v61_v2  ;;  %v53_v9 = vld [vmem:[#allocation3] sm:$0xff]  ;;  %v54_v10 = vld [vmem:[#allocation3 + $0x8] sm:$0xff]  ;;  %48 = vst.msk [vmem:[#allocation2 + $0x18] sm:$0xff] %vm45_vm1, %v275_v0  ;;  %s243_s23 = scalar_lea.vmem %s173_s1, 512  ;;  %p248_p11 = scmp.lt.s32.totalorder %s173_s1, %s173_s1 }
  0x21   :  { %96 = vmatprep.subr.mxu0 %v60_v3  ;;  %188 = vmatprep.subr.mxu1 %v60_v3  ;;  %p244_p10 = scmp.ne.s32.totalorder %s173_s1, %s243_s23  ;;  %p249_p12 = scmp.lt.s32.totalorder %s243_s23, %s243_s23 }
  0x22   :  { %97 = vmatpush1.msra.mxu0 %v59_v4  ;;  %192 = vmatpush1.msra.mxu1 %v59_v4 }
  0x23   :  { %98 = vmatprep.subr.mxu0 %v58_v5  ;;  %189 = vmatprep.subr.mxu1 %v58_v5  ;;  %p250_p13 = por %p249_p12, %p248_p11 }
  0x24   :  { %99 = vmatpush1.msra.mxu0 %v57_v6  ;;  %193 = vmatpush1.msra.mxu1 %v57_v6 }
  0x25   :  { %100 = vmatprep.subr.mxu0 %v56_v7  ;;  %190 = vmatprep.subr.mxu1 %v56_v7  ;;  %p251_p0 = pnand %p250_p13, %p244_p10 }
  0x26   :  { %101 = vmatpush1.msra.mxu0 %v55_v8  ;;  %194 = vmatpush1.msra.mxu1 %v55_v8  ;;  %v50_v13 = vld [vmem:[#allocation2 + $0x8] sm:$0xff] }
  0x27   :  { %185 = vmatmul.mubr.msk.f32.vlgmr.msra.gmra.mxu0 %vm63_vm0, %v53_v9  ;;  %186 = vmatmul.mubr.msk.f32.vlgmr.msra.gmra.mxu1 %vm63_vm0, %v54_v10  ;;  %v52_v14 = vld [vmem:[#allocation2 + $0x18] sm:$0xff] }
  0xe7   :  { %v136_v11 = vpop.f32.mrf.mxu0  ;;  %v142_v12 = vpop.f32.mrf.mxu1 }
  0xe8   :  { %163 = vst [vmem:[#allocation8] sm:$0xff] %v136_v11  ;;  %165 = vst [vmem:[#allocation8 + $0x10] sm:$0xff] %v142_v12 }
  0xe9   :  { %v138_v15 = vpop.f32.mrf.mxu0  ;;  %v144_v16 = vpop.f32.mrf.mxu1 }
  0xea   :  { %v148_v17 = vadd.f32 %v138_v15, %v50_v13  ;;  %v150_v18 = vadd.f32 %v144_v16, %v52_v14 }
  0xec   :  { %153 = vst.msk [vmem:[#allocation2 + $0x8] sm:$0xff] %vm45_vm1, %v148_v17  ;;  %155 = vst.msk [vmem:[#allocation2 + $0x18] sm:$0xff] %vm45_vm1, %v150_v18 }
  0xf3   :  { %v160_v19 = vld [vmem:[#allocation2 + $0x8] sm:$0xff]  ;;  %v162_v20 = vld [vmem:[#allocation2 + $0x18] sm:$0xff] }
  0xf4   :  { %164 = vst.msk [vmem:[#allocation8 + $0x8] sm:$0xff] %vm45_vm1, %v160_v19  ;;  %166 = vst.msk [vmem:[#allocation8 + $0x18] sm:$0xff] %vm45_vm1, %v162_v20 }
  0xf5   :  { %254 = shalt.err (!%p251_p0)
}
  0xf6   :  { %178 = dma.vmem_to_hbm [thread:$0]  %s173_s1, 512, %s315_s2, [#allocation5], %s273_s19, %s273_s19, %s274_s20  }
  0xf7   :  { %267 = dma.done.wait [#allocation5], 512  }
  0xf8   :  { %268 = vsyncadd [#allocation5], 4294966784 }
  0xf9   :  { %182 = vsyncpa [#allocation4], 1 }
  0xfa   :  { %183 = vsyncpa [#allocation7], 1 }
  0xfb   :  { %184 = vsyncpa [#allocation5], 1 }

</bundles_post_ra>
